<compile_context>
chip_gen: v5e
topology: v5e:2x2
jax: 0.10.0
libtpu: 0.0.40
codegen_flags: <defaults>
</compile_context>

<pallas_src>
import math

import jax
import jax.numpy as jnp
from jax.experimental import pallas as pl
from jax.experimental.pallas import tpu as pltpu

LRELU_SLOPE = 0.2
LRELU_GAIN = math.sqrt(2.0)  # bias_act 'lrelu' default gain in FullyConnectedLayer
OUT_LANES = 128              # lane-dense output width (column 0 holds the logit)
LANE = 128
_SINGLE_PASS_VMEM_BUDGET = 24 * 1024 * 1024  # double-buffered x + We for the fast path


def _round_up(x, m):
    return -(-x // m) * m


def _device_kind():
    try:
        return jax.devices()[0].device_kind.lower()
    except Exception:
        return ""


def _plan(chw, z):
    """K-tiling plan; single source of truth for the pre-padded We K extent."""
    kind = _device_kind()
    is_v5e = ("v5 lite" in kind) or ("v5e" in kind)
    is_v7 = "v7" in kind
    tb_cap = 128 if is_v5e else 256  # v5e MXU is 128 wide; 256 only helps v6e/v7x
    k_align = _round_up(chw, LANE)
    # Fast path: whole K in one grid step when double-buffered x + We tiles fit.
    single_bytes = 2 * (tb_cap * k_align * 4) + 2 * (k_align * z * 2)
    if single_bytes <= _SINGLE_PASS_VMEM_BUDGET:
        return {"single": True, "tk": k_align, "k_pad": k_align, "tb_cap": tb_cap}
    tk = 4096 if is_v7 else 2048  # >=0.5 MiB bf16 We tiles; v7x HBM is ~2x v6e
    return {"single": False, "tk": tk, "k_pad": _round_up(chw, tk), "tb_cap": tb_cap}


def _choose_tb(batch, cap):
    """Largest power-of-two batch tile <= cap that the (padded) batch can fill."""
    tb = 8
    target = _round_up(max(batch, 1), 8)
    while tb * 2 <= cap and tb * 2 <= target:
        tb *= 2
    return tb


def _lrelu(x):
    # f32 elementwise (v5e VPU/EUP have no native bf16 path).
    return jnp.where(x >= 0, x, LRELU_SLOPE * x) * LRELU_GAIN


def _head_mlp(h, wh_ref, bh_ref, wf_ref, bf_ref, o_ref):
    """_LatentBinaryClassifier: (n_layers-1) lrelu FC layers + final Z->1 linear."""
    n_hidden = wh_ref.shape[0]
    for l in range(n_hidden):  # static unroll, small L
        h = jnp.dot(h.astype(wh_ref.dtype), wh_ref[l],
                    preferred_element_type=jnp.float32) + bh_ref[l]
        h = _lrelu(h)
    # Final Z->1 layer as VPU mul + lane reduction (avoids a 1-column MXU matmul).
    logit = jnp.sum(h * wf_ref[...], axis=-1, keepdims=True) + bf_ref[...]
    # Lane-dense store; column 0 is sliced off outside the kernel.
    o_ref[...] = jnp.broadcast_to(logit, o_ref.shape)


def classifier_kernel_single(x_ref, we_ref, be_ref, wh_ref, bh_ref, wf_ref, bf_ref,
                             o_ref):
    """Fast path: whole K reduction in one grid step (grid = (batch tiles,)).

    x_ref : [TB, K]  f32 flattened image tile (cast to bf16 in-kernel)
    we_ref: [K, Z]   bf16 encoder projection (pre-scaled, [in, out], resident)
    """
    h = jnp.dot(x_ref[...].astype(we_ref.dtype), we_ref[...],
                preferred_element_type=jnp.float32) + be_ref[...]
    _head_mlp(h, wh_ref, bh_ref, wf_ref, bf_ref, o_ref)


def classifier_kernel_tiled(x_ref, we_ref, be_ref, wh_ref, bh_ref, wf_ref, bf_ref,
                            o_ref, acc_ref):
    """Large-CHW path: grid = (batch tiles, K tiles), K innermost ("arbitrary").

    x_ref : [TB, TK]  f32 tile (cast to bf16 in-kernel)
    we_ref: [TK, Z]   bf16 encoder weight tile (streamed/double-buffered)
    acc_ref:[TB, Z]   f32 encoder accumulator (VMEM scratch)
    """
    k = pl.program_id(1)

    @pl.when(k == 0)
    def _():
        acc_ref[...] = jnp.zeros_like(acc_ref)

    acc_ref[...] += jnp.dot(x_ref[...].astype(we_ref.dtype), we_ref[...],
                            preferred_element_type=jnp.float32)

    @pl.when(k == pl.num_programs(1) - 1)
    def _():
        _head_mlp(acc_ref[...] + be_ref[...], wh_ref, bh_ref, wf_ref, bf_ref, o_ref)


def _resident_specs(n_hidden, z, n_grid_axes):
    """Constant-index BlockSpecs for the resident head params."""
    if n_grid_axes == 1:
        z2 = lambda i: (0, 0)
        z3 = lambda i: (0, 0, 0)
    else:
        z2 = lambda i, k: (0, 0)
        z3 = lambda i, k: (0, 0, 0)
    return [
        pl.BlockSpec((1, z), z2),              # be
        pl.BlockSpec((n_hidden, z, z), z3),    # wh
        pl.BlockSpec((n_hidden, 1, z), z3),    # bh
        pl.BlockSpec((1, z), z2),              # wf
        pl.BlockSpec((1, 1), z2),              # bf
    ]


def binary_classifier_forward(img, params):
    """img: [B, C, H, W] float32 (NCHW). Returns squeezed logits like torch .squeeze()."""
    B = img.shape[0]
    x_flat = img.reshape(B, -1)          # row-major NCHW flatten == torch .view(B, -1); stays f32
    chw = x_flat.shape[1]
    k_pad, Z = params["we"].shape
    n_hidden = params["wh"].shape[0]

    plan = _plan(chw, Z)
    assert plan["k_pad"] == k_pad, "params['we'] K padding inconsistent with device plan"
    tk = plan["tk"]
    tb = _choose_tb(B, plan["tb_cap"])
    b_pad = _round_up(B, tb)

    # Only pad what's needed: tiny batch pad, and K pad only when CHW isn't aligned
    # (the frozen We was already padded once in init_params).
    pad_b, pad_k = b_pad - B, k_pad - chw
    if pad_b or pad_k:
        x_flat = jnp.pad(x_flat, ((0, pad_b), (0, pad_k)))

    nb = b_pad // tb

    # Explicit scoped-VMEM sizing (v5e default is 16 MiB; v7x physical is 64 MiB).
    est = (2 * tb * tk * 4                                        # x tile, 2x, f32
           + 2 * tk * Z * 2                                       # We tile, 2x, bf16
           + 2 * (n_hidden * Z * Z * 2 + (n_hidden + 2) * Z * 4)  # resident head params
           + tb * Z * 4                                           # accumulator scratch
           + 2 * tb * OUT_LANES * 4)                              # output tile
    vmem_limit = int(min(max(est + (4 << 20), 32 << 20), 64 << 20))

    if plan["single"]:
        grid = (nb,)
        in_specs = [pl.BlockSpec((tb, k_pad), lambda i: (i, 0)),
                    pl.BlockSpec((k_pad, Z), lambda i: (0, 0))] + _resident_specs(n_hidden, Z, 1)
        out_spec = pl.BlockSpec((tb, OUT_LANES), lambda i: (i, 0))
        kernel = classifier_kernel_single
        scratch = []
        dims = ("parallel",)
    else:
        grid = (nb, k_pad // tk)
        in_specs = [pl.BlockSpec((tb, tk), lambda i, k: (i, k)),
                    pl.BlockSpec((tk, Z), lambda i, k: (k, 0))] + _resident_specs(n_hidden, Z, 2)
        out_spec = pl.BlockSpec((tb, OUT_LANES), lambda i, k: (i, 0))
        kernel = classifier_kernel_tiled
        scratch = [pltpu.VMEM((tb, Z), jnp.float32)]
        dims = ("parallel", "arbitrary")

    out = pl.pallas_call(
        kernel,
        out_shape=jax.ShapeDtypeStruct((b_pad, OUT_LANES), jnp.float32),
        grid_spec=pltpu.PrefetchScalarGridSpec(
            num_scalar_prefetch=0,
            grid=grid,
            in_specs=in_specs,
            out_specs=out_spec,
            scratch_shapes=scratch,
        ),
        compiler_params=pltpu.CompilerParams(
            dimension_semantics=dims,
            vmem_limit_bytes=vmem_limit),
    )(x_flat, params["we"], params["be"], params["wh"], params["bh"],
      params["wf"], params["bf"])

    # Drop batch padding, take lane 0, mirror _LatentBinaryClassifier's .squeeze().
    return jnp.squeeze(out[:B, 0])


def init_params(key, in_features, z_dims, n_layers):
    """Deterministic FullyConnectedLayer-style init.

    torch weight = randn(out, in); effective forward weight = weight / sqrt(in).
    The 1/sqrt(in) gain is pre-folded; MXU operands are stored transposed
    [in, out] in bf16. The frozen encoder weight is K-padded/cast ONCE here so
    the forward does no per-call weight round trip.
    """
    plan = _plan(in_features, z_dims)
    k_pad = plan["k_pad"]
    k_e, k_h, k_f = jax.random.split(key, 3)

    we = jax.random.normal(k_e, (z_dims, in_features), jnp.float32) / math.sqrt(in_features)
    we_p = jnp.zeros((k_pad, z_dims), jnp.bfloat16)
    we_p = we_p.at[:in_features, :].set(we.T.astype(jnp.bfloat16))
    be = jnp.zeros((1, z_dims), jnp.float32)

    n_hidden = n_layers - 1
    kh = jax.random.split(k_h, n_hidden)
    wh = jnp.stack(
        [jax.random.normal(kh[i], (z_dims, z_dims), jnp.float32) / math.sqrt(z_dims)
         for i in range(n_hidden)]
    )  # [L-1, out, in]
    bh = jnp.zeros((n_hidden, 1, z_dims), jnp.float32)

    wf = jax.random.normal(k_f, (1, z_dims), jnp.float32) / math.sqrt(z_dims)  # [1(out), Z(in)]
    bf = jnp.zeros((1, 1), jnp.float32)

    return {
        "we": we_p,                                               # [k_pad, Z] bf16
        "be": be,                                                 # [1, Z]  f32
        "wh": jnp.transpose(wh, (0, 2, 1)).astype(jnp.bfloat16),  # [L-1, Z, Z] bf16 ([in,out])
        "bh": bh,                                                 # [L-1, 1, Z] f32
        "wf": wf,                                                 # [1, Z]  f32 row
        "bf": bf,                                                 # [1, 1]  f32
    }


def reference_forward(img, params):
    """Plain-JAX reference with identical precision policy (bf16 MXU, f32 math)."""
    B = img.shape[0]
    x = img.reshape(B, -1).astype(jnp.bfloat16)
    we = params["we"][: x.shape[1]]
    h = jnp.dot(x, we, preferred_element_type=jnp.float32) + params["be"]
    for l in range(params["wh"].shape[0]):
        h = jnp.dot(h.astype(jnp.bfloat16), params["wh"][l],
                    preferred_element_type=jnp.float32) + params["bh"][l]
        h = _lrelu(h)
    out = jnp.sum(h * params["wf"], axis=-1) + params["bf"][0, 0]
    return jnp.squeeze(out)


if __name__ == "__main__":
    # Small shapes consistent with the module's forward: NCHW image in, per-sample logit out.
    B, C, H, W = 2, 3, 16, 16
    Z_DIMS = 128
    N_LAYERS = 4

    key = jax.random.PRNGKey(0)
    k_img, k_params = jax.random.split(key)

    img = jax.random.normal(k_img, (B, C, H, W), jnp.float32)
    params = init_params(k_params, C * H * W, Z_DIMS, N_LAYERS)

    pred = jax.block_until_ready(binary_classifier_forward(img, params))
    ref = jax.block_until_ready(reference_forward(img, params))

    assert pred.shape == (B,), pred.shape
    assert jnp.allclose(pred, ref, atol=2e-3, rtol=2e-3), (pred, ref)
    print("KERNEL_OK")
</pallas_src>

<mosaic_0001>
module attributes {stable_mosaic.version = 11 : i64} {
  func.func @classifier_kernel_single(%arg0: i32, %arg1: memref<8x768xf32, #tpu.memory_space<vmem>>, %arg2: memref<768x128xbf16, #tpu.memory_space<vmem>>, %arg3: memref<1x128xf32, #tpu.memory_space<vmem>>, %arg4: memref<3x128x128xbf16, #tpu.memory_space<vmem>>, %arg5: memref<3x1x128xf32, #tpu.memory_space<vmem>>, %arg6: memref<1x128xf32, #tpu.memory_space<vmem>>, %arg7: memref<1x1xf32, #tpu.memory_space<vmem>>, %arg8: memref<8x128xf32, #tpu.memory_space<vmem>>) attributes {dimension_semantics = [#tpu.dimension_semantics<parallel>], iteration_bounds = array<i64: 1>, scalar_prefetch = 0 : i64, scratch_operands = 0 : i64, tpu.core_type = #tpu.core_type<tc>, window_params = [{transform_indices = @transform_0, window_bounds = array<i64: 8, 768>}, {pipeline_mode = #tpu.pipeline_mode<synchronous>, transform_indices = @transform_1, window_bounds = array<i64: 768, 128>}, {pipeline_mode = #tpu.pipeline_mode<synchronous>, transform_indices = @transform_2, window_bounds = array<i64: 1, 128>}, {pipeline_mode = #tpu.pipeline_mode<synchronous>, transform_indices = @transform_3, window_bounds = array<i64: 3, 128, 128>}, {pipeline_mode = #tpu.pipeline_mode<synchronous>, transform_indices = @transform_4, window_bounds = array<i64: 3, 1, 128>}, {pipeline_mode = #tpu.pipeline_mode<synchronous>, transform_indices = @transform_5, window_bounds = array<i64: 1, 128>}, {pipeline_mode = #tpu.pipeline_mode<synchronous>, transform_indices = @transform_6, window_bounds = array<i64: 1, 1>}, {transform_indices = @transform_7, window_bounds = array<i64: 8, 128>}]} {
    %c0 = arith.constant 0 : index
    %c0_0 = arith.constant 0 : index
    %0 = vector.load %arg1[%c0, %c0_0] : memref<8x768xf32, #tpu.memory_space<vmem>>, vector<8x768xf32>
    %1 = arith.truncf %0 : vector<8x768xf32> to vector<8x768xbf16>
    %c0_1 = arith.constant 0 : index
    %c0_2 = arith.constant 0 : index
    %2 = vector.load %arg2[%c0_1, %c0_2] : memref<768x128xbf16, #tpu.memory_space<vmem>>, vector<768x128xbf16>
    %cst = arith.constant dense<0.000000e+00> : vector<8x128xf32>
    %3 = tpu.matmul %1, %2, %cst {dimension_numbers = #tpu.dot_dimension_numbers<[1], [0], [0], [1], [0, 0, 1, 1], [], []>} : vector<8x768xbf16>, vector<768x128xbf16>, vector<8x128xf32> -> vector<8x128xf32>
    %c0_3 = arith.constant 0 : index
    %c0_4 = arith.constant 0 : index
    %4 = vector.load %arg3[%c0_3, %c0_4] : memref<1x128xf32, #tpu.memory_space<vmem>>, vector<1x128xf32>
    %5 = vector.broadcast %4 : vector<1x128xf32> to vector<8x128xf32>
    %6 = arith.addf %3, %5 : vector<8x128xf32>
    %7 = arith.truncf %6 : vector<8x128xf32> to vector<8x128xbf16>
    %c0_5 = arith.constant 0 : index
    %c0_6 = arith.constant 0 : index
    %c0_7 = arith.constant 0 : index
    %8 = vector.load %arg4[%c0_5, %c0_6, %c0_7] : memref<3x128x128xbf16, #tpu.memory_space<vmem>>, vector<1x128x128xbf16>
    %9 = vector.shape_cast %8 : vector<1x128x128xbf16> to vector<128x128xbf16>
    %cst_8 = arith.constant dense<0.000000e+00> : vector<8x128xf32>
    %10 = tpu.matmul %7, %9, %cst_8 {dimension_numbers = #tpu.dot_dimension_numbers<[1], [0], [0], [1], [0, 0, 1, 1], [], []>} : vector<8x128xbf16>, vector<128x128xbf16>, vector<8x128xf32> -> vector<8x128xf32>
    %c0_9 = arith.constant 0 : index
    %c0_10 = arith.constant 0 : index
    %c0_11 = arith.constant 0 : index
    %11 = vector.load %arg5[%c0_9, %c0_10, %c0_11] : memref<3x1x128xf32, #tpu.memory_space<vmem>>, vector<1x1x128xf32>
    %12 = vector.shape_cast %11 : vector<1x1x128xf32> to vector<1x128xf32>
    %13 = vector.broadcast %12 : vector<1x128xf32> to vector<8x128xf32>
    %14 = arith.addf %10, %13 : vector<8x128xf32>
    %cst_12 = arith.constant 0.000000e+00 : f32
    %15 = vector.broadcast %cst_12 : f32 to vector<8x128xf32>
    %16 = arith.cmpf oge, %14, %15 : vector<8x128xf32>
    %cst_13 = arith.constant 2.000000e-01 : f32
    %17 = vector.broadcast %cst_13 : f32 to vector<8x128xf32>
    %18 = arith.mulf %17, %14 : vector<8x128xf32>
    %19 = arith.select %16, %14, %18 : vector<8x128xi1>, vector<8x128xf32>
    %cst_14 = arith.constant 1.41421354 : f32
    %20 = vector.broadcast %cst_14 : f32 to vector<8x128xf32>
    %21 = arith.mulf %19, %20 : vector<8x128xf32>
    %22 = arith.truncf %21 : vector<8x128xf32> to vector<8x128xbf16>
    %c1 = arith.constant 1 : index
    %c0_15 = arith.constant 0 : index
    %c0_16 = arith.constant 0 : index
    %23 = vector.load %arg4[%c1, %c0_15, %c0_16] : memref<3x128x128xbf16, #tpu.memory_space<vmem>>, vector<1x128x128xbf16>
    %24 = vector.shape_cast %23 : vector<1x128x128xbf16> to vector<128x128xbf16>
    %cst_17 = arith.constant dense<0.000000e+00> : vector<8x128xf32>
    %25 = tpu.matmul %22, %24, %cst_17 {dimension_numbers = #tpu.dot_dimension_numbers<[1], [0], [0], [1], [0, 0, 1, 1], [], []>} : vector<8x128xbf16>, vector<128x128xbf16>, vector<8x128xf32> -> vector<8x128xf32>
    %c1_18 = arith.constant 1 : index
    %c0_19 = arith.constant 0 : index
    %c0_20 = arith.constant 0 : index
    %26 = vector.load %arg5[%c1_18, %c0_19, %c0_20] : memref<3x1x128xf32, #tpu.memory_space<vmem>>, vector<1x1x128xf32>
    %27 = vector.shape_cast %26 : vector<1x1x128xf32> to vector<1x128xf32>
    %28 = vector.broadcast %27 : vector<1x128xf32> to vector<8x128xf32>
    %29 = arith.addf %25, %28 : vector<8x128xf32>
    %cst_21 = arith.constant 0.000000e+00 : f32
    %30 = vector.broadcast %cst_21 : f32 to vector<8x128xf32>
    %31 = arith.cmpf oge, %29, %30 : vector<8x128xf32>
    %cst_22 = arith.constant 2.000000e-01 : f32
    %32 = vector.broadcast %cst_22 : f32 to vector<8x128xf32>
    %33 = arith.mulf %32, %29 : vector<8x128xf32>
    %34 = arith.select %31, %29, %33 : vector<8x128xi1>, vector<8x128xf32>
    %cst_23 = arith.constant 1.41421354 : f32
    %35 = vector.broadcast %cst_23 : f32 to vector<8x128xf32>
    %36 = arith.mulf %34, %35 : vector<8x128xf32>
    %37 = arith.truncf %36 : vector<8x128xf32> to vector<8x128xbf16>
    %c2 = arith.constant 2 : index
    %c0_24 = arith.constant 0 : index
    %c0_25 = arith.constant 0 : index
    %38 = vector.load %arg4[%c2, %c0_24, %c0_25] : memref<3x128x128xbf16, #tpu.memory_space<vmem>>, vector<1x128x128xbf16>
    %39 = vector.shape_cast %38 : vector<1x128x128xbf16> to vector<128x128xbf16>
    %cst_26 = arith.constant dense<0.000000e+00> : vector<8x128xf32>
    %40 = tpu.matmul %37, %39, %cst_26 {dimension_numbers = #tpu.dot_dimension_numbers<[1], [0], [0], [1], [0, 0, 1, 1], [], []>} : vector<8x128xbf16>, vector<128x128xbf16>, vector<8x128xf32> -> vector<8x128xf32>
    %c2_27 = arith.constant 2 : index
    %c0_28 = arith.constant 0 : index
    %c0_29 = arith.constant 0 : index
    %41 = vector.load %arg5[%c2_27, %c0_28, %c0_29] : memref<3x1x128xf32, #tpu.memory_space<vmem>>, vector<1x1x128xf32>
    %42 = vector.shape_cast %41 : vector<1x1x128xf32> to vector<1x128xf32>
    %43 = vector.broadcast %42 : vector<1x128xf32> to vector<8x128xf32>
    %44 = arith.addf %40, %43 : vector<8x128xf32>
    %cst_30 = arith.constant 0.000000e+00 : f32
    %45 = vector.broadcast %cst_30 : f32 to vector<8x128xf32>
    %46 = arith.cmpf oge, %44, %45 : vector<8x128xf32>
    %cst_31 = arith.constant 2.000000e-01 : f32
    %47 = vector.broadcast %cst_31 : f32 to vector<8x128xf32>
    %48 = arith.mulf %47, %44 : vector<8x128xf32>
    %49 = arith.select %46, %44, %48 : vector<8x128xi1>, vector<8x128xf32>
    %cst_32 = arith.constant 1.41421354 : f32
    %50 = vector.broadcast %cst_32 : f32 to vector<8x128xf32>
    %51 = arith.mulf %49, %50 : vector<8x128xf32>
    %c0_33 = arith.constant 0 : index
    %c0_34 = arith.constant 0 : index
    %52 = vector.load %arg6[%c0_33, %c0_34] : memref<1x128xf32, #tpu.memory_space<vmem>>, vector<1x128xf32>
    %53 = vector.broadcast %52 : vector<1x128xf32> to vector<8x128xf32>
    %54 = arith.mulf %51, %53 : vector<8x128xf32>
    %cst_35 = arith.constant dense<0.000000e+00> : vector<8xf32>
    %55 = vector.multi_reduction <add>, %54, %cst_35 [1] : vector<8x128xf32> to vector<8xf32>
    %56 = vector.shape_cast %55 : vector<8xf32> to vector<8x1xf32>
    %c0_36 = arith.constant 0 : index
    %c0_37 = arith.constant 0 : index
    %57 = vector.load %arg7[%c0_36, %c0_37] : memref<1x1xf32, #tpu.memory_space<vmem>>, vector<1x1xf32>
    %58 = vector.broadcast %57 : vector<1x1xf32> to vector<8x1xf32>
    %59 = arith.addf %56, %58 : vector<8x1xf32>
    %60 = vector.shape_cast %59 : vector<8x1xf32> to vector<8x1xf32>
    %61 = vector.broadcast %60 : vector<8x1xf32> to vector<8x128xf32>
    %c0_38 = arith.constant 0 : index
    %c0_39 = arith.constant 0 : index
    %62 = vector.load %arg8[%c0_38, %c0_39] : memref<8x128xf32, #tpu.memory_space<vmem>>, vector<8x128xf32>
    tpu.vector_store %arg8[%c0_38, %c0_39], %61 {strides = array<i32>} : memref<8x128xf32, #tpu.memory_space<vmem>>, vector<8x128xf32>,
    return
  }
  func.func @transform_0(%arg0: i32) -> (i32, i32) {
    %c0_i32 = arith.constant 0 : i32
    %c0_i32_0 = arith.constant 0 : i32
    return %arg0, %c0_i32 : i32, i32
  }
  func.func @transform_1(%arg0: i32) -> (i32, i32) {
    %c0_i32 = arith.constant 0 : i32
    %c0_i32_0 = arith.constant 0 : i32
    %c0_i32_1 = arith.constant 0 : i32
    return %c0_i32, %c0_i32_0 : i32, i32
  }
  func.func @transform_2(%arg0: i32) -> (i32, i32) {
    %c0_i32 = arith.constant 0 : i32
    %c0_i32_0 = arith.constant 0 : i32
    %c0_i32_1 = arith.constant 0 : i32
    return %c0_i32, %c0_i32_0 : i32, i32
  }
  func.func @transform_3(%arg0: i32) -> (i32, i32, i32) {
    %c0_i32 = arith.constant 0 : i32
    %c0_i32_0 = arith.constant 0 : i32
    %c0_i32_1 = arith.constant 0 : i32
    %c0_i32_2 = arith.constant 0 : i32
    return %c0_i32, %c0_i32_0, %c0_i32_1 : i32, i32, i32
  }
  func.func @transform_4(%arg0: i32) -> (i32, i32, i32) {
    %c0_i32 = arith.constant 0 : i32
    %c0_i32_0 = arith.constant 0 : i32
    %c0_i32_1 = arith.constant 0 : i32
    %c0_i32_2 = arith.constant 0 : i32
    return %c0_i32, %c0_i32_0, %c0_i32_1 : i32, i32, i32
  }
  func.func @transform_5(%arg0: i32) -> (i32, i32) {
    %c0_i32 = arith.constant 0 : i32
    %c0_i32_0 = arith.constant 0 : i32
    %c0_i32_1 = arith.constant 0 : i32
    return %c0_i32, %c0_i32_0 : i32, i32
  }
  func.func @transform_6(%arg0: i32) -> (i32, i32) {
    %c0_i32 = arith.constant 0 : i32
    %c0_i32_0 = arith.constant 0 : i32
    %c0_i32_1 = arith.constant 0 : i32
    return %c0_i32, %c0_i32_0 : i32, i32
  }
  func.func @transform_7(%arg0: i32) -> (i32, i32) {
    %c0_i32 = arith.constant 0 : i32
    %c0_i32_0 = arith.constant 0 : i32
    return %arg0, %c0_i32 : i32, i32
  }
}

</mosaic_0001>

<bundles_post_ra>
// kernel: tpu_custom_call.1
= control target key start
LH: loop header
LB: loop body
LE: loop exit
PB: predicated region body
PF: predicated region fallthrough
CT: control target
= control target key end

     0   :  { %s1405_s0 = inlined_call_operand.hbm [shape: f32[8,768], index: 0, kind: input, shape index: {}]   ;;  %s1406_s1 = inlined_call_operand.hbm [shape: bf16[768,128], index: 1, kind: input, shape index: {}]   ;;  %s1407_s2 = inlined_call_operand.vmem [shape: f32[1,128], index: 2, kind: input, shape index: {}]   ;;  %s1408_s3 = inlined_call_operand.hbm [shape: bf16[3,128,128], index: 3, kind: input, shape index: {}]   ;;  %s1409_s4 = inlined_call_operand.vmem [shape: f32[3,1,128], index: 4, kind: input, shape index: {}]   ;;  %s1410_s5 = inlined_call_operand.vmem [shape: f32[1,128], index: 5, kind: input, shape index: {}]   ;;  %s1411_s6 = inlined_call_operand.<no memory space> [shape: f32[1,1], index: 6, kind: input, shape index: {}]   ;;  %s1412_s7 = inlined_call_operand.hbm [shape: f32[8,128], index: 7, kind: output, shape index: {}]  }
   0x1   :  { %v12_v0 = vstv %s1411_s6 }
   0x2   :  { %13 = vst [vmem:[#allocation2] sm:$0x1] %v12_v0 }
   0x3   :  { %14 = vsyncpa [#allocation4], 0 }
   0x4   :  { %15 = vsyncpa [#allocation7], 0  ;;  %s32_s28 = sshll.u32 %s1406_s1, 4  ;;  %s33_s28 = int_to_ptr.hbm [resolvable:$true] %s32_s28 }
   0x5   :  { %16 = vsyncpa [#allocation5], 0  ;;  %s1328_s29 = smov [#allocation6]   ;;  %s22_s10 = sshll.u32 %s1405_s0, 4  ;;  %s23_s10 = int_to_ptr.hbm [resolvable:$true] %s22_s10 }
   0x6   :  { %s34_s30 = sshll.u32 %s1328_s29, 4  ;;  %s1329_s11 = smov 64   ;;  %s35_s30 = int_to_ptr.vmem [resolvable:$true] %s34_s30 }
   0x7   :  { %s1330_s12 = smov 4   ;;  %s1331_s6 = smov [#allocation3]  }
   0x8   :  { %40 = dma.hbm_to_vmem [thread:$0]  %s33_s28, 6144, %s35_s30, [#allocation7], %s1329_s11, %s1329_s11, %s1330_s12  }
   0x9   :  { %s24_s13 = sshll.u32 %s1331_s6, 4  ;;  %s47_s16 = sshll.u32 %s1408_s3, 4  ;;  %s25_s13 = int_to_ptr.vmem [resolvable:$true] %s24_s13  ;;  %s48_s16 = int_to_ptr.hbm [resolvable:$true] %s47_s16 }
   0xa   :  { %27 = dma.hbm_to_vmem [thread:$0]  %s23_s10, 768, %s25_s13, [#allocation4]  }
   0xb   :  { %s1332_s1 = smov [#allocation8]  }
   0xc   :  { %s49_s17 = sshll.u32 %s1332_s1, 4  ;;  %s50_s17 = int_to_ptr.vmem [resolvable:$true] %s49_s17 }
   0xd   :  { %55 = dma.hbm_to_vmem [thread:$0]  %s48_s16, 3072, %s50_s17, [#allocation7], %s1329_s11, %s1329_s11, %s1330_s12  }
   0xe   :  { %1322 = dma.done.wait [#allocation4], 768  }
   0xf   :  { %1323 = vsyncadd [#allocation4], 4294966528 }
  0x10   :  { %1324 = dma.done.wait [#allocation7], 9216  }
  0x11   :  { %1325 = vsyncadd [#allocation7], 4294958080  ;;  %v1147_v1 = vld [vmem:[#allocation6 + $0x38] sm:$0xff]  ;;  %v1146_v3 = vld [vmem:[#allocation6 + $0x30] sm:$0xff]  ;;  %s839_s28 = sshll.u32 %s1412_s7, 4  ;;  %s840_s28 = int_to_ptr.hbm [resolvable:$true] %s839_s28 }
  0x12   :  { %v1155_v2 = vld [vmem:[#allocation6 + $0x78] sm:$0xff]  ;;  %474 = vmatpush.bf16.msra.mxu0 %v1147_v1  ;;  %v1154_v4 = vld [vmem:[#allocation6 + $0x70] sm:$0xff]  ;;  %v1145_v9 = vld [vmem:[#allocation6 + $0x28] sm:$0xff] }
  0x13   :  { %487 = vmatpush.bf16.msra.mxu1 %v1155_v2  ;;  %v1163_v5 = vld [vmem:[#allocation6 + $0xb8] sm:$0xff]  ;;  %v1162_v7 = vld [vmem:[#allocation6 + $0xb0] sm:$0xff]  ;;  %v1153_v10 = vld [vmem:[#allocation6 + $0x68] sm:$0xff] }
  0x14   :  { %v1171_v6 = vld [vmem:[#allocation6 + $0xf8] sm:$0xff]  ;;  %500 = vmatpush.bf16.msra.mxu2 %v1163_v5  ;;  %v1170_v8 = vld [vmem:[#allocation6 + $0xf0] sm:$0xff]  ;;  %v1161_v11 = vld [vmem:[#allocation6 + $0xa8] sm:$0xff] }
  0x15   :  { %513 = vmatpush.bf16.msra.mxu3 %v1171_v6  ;;  %v1169_v12 = vld [vmem:[#allocation6 + $0xe8] sm:$0xff]  ;;  %v1144_v13 = vld [vmem:[#allocation6 + $0x20] sm:$0xff]  ;;  %v1143_v17 = vld [vmem:[#allocation6 + $0x18] sm:$0xff] }
  0x16   :  { %475 = vmatpush.bf16.msra.mxu0 %v1146_v3  ;;  %v1152_v14 = vld [vmem:[#allocation6 + $0x60] sm:$0xff]  ;;  %v1151_v18 = vld [vmem:[#allocation6 + $0x58] sm:$0xff]  ;;  %v1142_v21 = vld [vmem:[#allocation6 + $0x10] sm:$0xff] }
  0x17   :  { %488 = vmatpush.bf16.msra.mxu1 %v1154_v4  ;;  %v1160_v15 = vld [vmem:[#allocation6 + $0xa0] sm:$0xff]  ;;  %v1159_v19 = vld [vmem:[#allocation6 + $0x98] sm:$0xff]  ;;  %v1150_v22 = vld [vmem:[#allocation6 + $0x50] sm:$0xff] }
  0x18   :  { %501 = vmatpush.bf16.msra.mxu2 %v1162_v7  ;;  %v1168_v16 = vld [vmem:[#allocation6 + $0xe0] sm:$0xff]  ;;  %v1167_v20 = vld [vmem:[#allocation6 + $0xd8] sm:$0xff]  ;;  %v1158_v23 = vld [vmem:[#allocation6 + $0x90] sm:$0xff] }
  0x19   :  { %514 = vmatpush.bf16.msra.mxu3 %v1170_v8  ;;  %v1166_v24 = vld [vmem:[#allocation6 + $0xd0] sm:$0xff]  ;;  %v1141_v25 = vld [vmem:[#allocation6 + $0x8] sm:$0xff]  ;;  %v1140_v28 = vld [vmem:[#allocation6] sm:$0xff] }
  0x1a   :  { %476 = vmatpush.bf16.msra.mxu0 %v1145_v9  ;;  %v1149_v26 = vld [vmem:[#allocation6 + $0x48] sm:$0xff]  ;;  %v1148_v30 = vld [vmem:[#allocation6 + $0x40] sm:$0xff]  ;;  %v74_v31 = vld [vmem:[#allocation3] sm:$0xff] }
  0x1b   :  { %489 = vmatpush.bf16.msra.mxu1 %v1153_v10  ;;  %v1157_v27 = vld [vmem:[#allocation6 + $0x88] sm:$0xff]  ;;  %v75_v32 = vld [vmem:[#allocation3 + $0x8] sm:$0xff]  ;;  %v1156_v35 = vld [vmem:[#allocation6 + $0x80] sm:$0xff]  ;;  %v80_v36 = vpack.c.bf16 %v74_v31, %v74_v31 }
  0x1c   :  { %502 = vmatpush.bf16.msra.mxu2 %v1161_v11  ;;  %v1165_v29 = vld [vmem:[#allocation6 + $0xc8] sm:$0xff]  ;;  %v1179_v33 = vld [vmem:[#allocation6 + $0x138] sm:$0xff]  ;;  %v81_v37 = vpack.c.bf16 %v75_v32, %v75_v32  ;;  %v76_v38 = vld [vmem:[#allocation3 + $0x10] sm:$0xff] }
  0x1d   :  { %515 = vmatpush.bf16.msra.mxu3 %v1169_v12  ;;  %v1187_v34 = vld [vmem:[#allocation6 + $0x178] sm:$0xff]  ;;  %v1164_v39 = vld [vmem:[#allocation6 + $0xc0] sm:$0xff]  ;;  %v77_v40 = vld [vmem:[#allocation3 + $0x18] sm:$0xff]  ;;  %v82_v43 = vpack.c.bf16 %v76_v38, %v76_v38 }
  0x1e   :  { %477 = vmatpush.bf16.msra.mxu0 %v1144_v13  ;;  %v1178_v41 = vld [vmem:[#allocation6 + $0x130] sm:$0xff]  ;;  %v83_v44 = vpack.c.bf16 %v77_v40, %v77_v40  ;;  %v1177_v45 = vld [vmem:[#allocation6 + $0x128] sm:$0xff]  ;;  %v1176_v47 = vld [vmem:[#allocation6 + $0x120] sm:$0xff] }
  0x1f   :  { %490 = vmatpush.bf16.msra.mxu1 %v1152_v14  ;;  %v1186_v42 = vld [vmem:[#allocation6 + $0x170] sm:$0xff]  ;;  %v1185_v46 = vld [vmem:[#allocation6 + $0x168] sm:$0xff]  ;;  %v1184_v48 = vld [vmem:[#allocation6 + $0x160] sm:$0xff] }
  0x20   :  { %503 = vmatpush.bf16.msra.mxu2 %v1160_v15  ;;  %v1175_v49 = vld [vmem:[#allocation6 + $0x118] sm:$0xff]  ;;  %v1174_v51 = vld [vmem:[#allocation6 + $0x110] sm:$0xff]  ;;  %v1173_v53 = vld [vmem:[#allocation6 + $0x108] sm:$0xff] }
  0x21   :  { %516 = vmatpush.bf16.msra.mxu3 %v1168_v16  ;;  %v1183_v50 = vld [vmem:[#allocation6 + $0x158] sm:$0xff]  ;;  %v1182_v52 = vld [vmem:[#allocation6 + $0x150] sm:$0xff]  ;;  %v1181_v54 = vld [vmem:[#allocation6 + $0x148] sm:$0xff] }
  0x22   :  { %478 = vmatpush.bf16.msra.mxu0 %v1143_v17  ;;  %v1172_v55 = vld [vmem:[#allocation6 + $0x100] sm:$0xff]  ;;  %v78_v57 = vld [vmem:[#allocation3 + $0x20] sm:$0xff]  ;;  %v79_v58 = vld [vmem:[#allocation3 + $0x28] sm:$0xff] }
  0x23   :  { %491 = vmatpush.bf16.msra.mxu1 %v1151_v18  ;;  %v1180_v56 = vld [vmem:[#allocation6 + $0x140] sm:$0xff]  ;;  %v84_v59 = vpack.c.bf16 %v78_v57, %v78_v57  ;;  %v85_v60 = vpack.c.bf16 %v79_v58, %v79_v58  ;;  %v1195_v61 = vld [vmem:[#allocation8 + $0x38] sm:$0xff]  ;;  %v1194_v62 = vld [vmem:[#allocation8 + $0x30] sm:$0xff] }
  0x24   :  { %504 = vmatpush.bf16.msra.mxu2 %v1159_v19  ;;  %v1193_v63 = vld [vmem:[#allocation8 + $0x28] sm:$0xff]  ;;  %v1192_v0 = vld [vmem:[#allocation8 + $0x20] sm:$0xff]  ;;  %v1191_v1 = vld [vmem:[#allocation8 + $0x18] sm:$0xff] }
  0x25   :  { %517 = vmatpush.bf16.msra.mxu3 %v1167_v20  ;;  %v1190_v2 = vld [vmem:[#allocation8 + $0x10] sm:$0xff]  ;;  %v1189_v3 = vld [vmem:[#allocation8 + $0x8] sm:$0xff]  ;;  %v1188_v4 = vld [vmem:[#allocation8] sm:$0xff] }
  0x26   :  { %479 = vmatpush.bf16.msra.mxu0 %v1142_v21  ;;  %v1203_v7 = vld [vmem:[#allocation8 + $0x78] sm:$0xff]  ;;  %v1202_v8 = vld [vmem:[#allocation8 + $0x70] sm:$0xff]  ;;  %v1201_v13 = vld [vmem:[#allocation8 + $0x68] sm:$0xff] }
  0x27   :  { %492 = vmatpush.bf16.msra.mxu1 %v1150_v22  ;;  %v1220_v14 = vld [vmem:[%s1407_s2] ss:$0 sm:$0xff]  ;;  %v1200_v15 = vld [vmem:[#allocation8 + $0x60] sm:$0xff]  ;;  %v1199_v19 = vld [vmem:[#allocation8 + $0x58] sm:$0xff] }
  0x28   :  { %505 = vmatpush.bf16.msra.mxu2 %v1158_v23  ;;  %v1198_v21 = vld [vmem:[#allocation8 + $0x50] sm:$0xff]  ;;  %v1197_v31 = vld [vmem:[#allocation8 + $0x48] sm:$0xff]  ;;  %v1196_v32 = vld [vmem:[#allocation8 + $0x40] sm:$0xff] }
  0x29   :  { %518 = vmatpush.bf16.msra.mxu3 %v1166_v24  ;;  %v1206_v38 = vld [vmem:[#allocation8 + $0x90] sm:$0xff] }
  0x2a   :  { %480 = vmatpush.bf16.msra.mxu0 %v1141_v25  ;;  %v1223_v57 = vld [vmem:[%s1409_s4 + $0x2] ss:$0 sm:$0xff] }
  0x2b   :  { %493 = vmatpush.bf16.msra.mxu1 %v1149_v26 }
  0x2c   :  { %506 = vmatpush.bf16.msra.mxu2 %v1157_v27 }
  0x2d   :  { %519 = vmatpush.bf16.msra.mxu3 %v1165_v29 }
  0x2e   :  { %481 = vmatpush.bf16.msra.mxu0 %v1140_v28 }
  0x2f   :  { %494 = vmatpush.bf16.msra.mxu1 %v1148_v30 }
  0x30   :  { %507 = vmatpush.bf16.msra.mxu2 %v1156_v35  ;;  %v1209_v35 = vld [vmem:[#allocation8 + $0xa8] sm:$0xff] }
  0x31   :  { %482 = vmatmul.bf16.vlgmr.msra.gmra.mxu0 %v80_v36  ;;  %520 = vmatpush.bf16.msra.mxu3 %v1164_v39  ;;  %v1208_v36 = vld [vmem:[#allocation8 + $0xa0] sm:$0xff]  ;;  %v1221_v39 = vld [vmem:[%s1409_s4] ss:$0 sm:$0xff] }
  0x32   :  { %526 = vmatpush.bf16.msrb.mxu0 %v1179_v33  ;;  %495 = vmatmul.bf16.vlgmr.msra.gmra.mxu1 %v81_v37  ;;  %v1211_v33 = vld [vmem:[#allocation8 + $0xb8] sm:$0xff] }
  0x33   :  { %539 = vmatpush.bf16.msrb.mxu1 %v1187_v34  ;;  %508 = vmatmul.bf16.vlgmr.msra.gmra.mxu2 %v82_v43  ;;  %v1210_v34 = vld [vmem:[#allocation8 + $0xb0] sm:$0xff]  ;;  %v1207_v37 = vld [vmem:[#allocation8 + $0x98] sm:$0xff] }
  0x34   :  { %521 = vmatmul.bf16.vlgmr.msra.gmra.mxu3 %v83_v44  ;;  %621 = vmatpush.bf16.msrb.mxu2 %v1195_v61  ;;  %v1224_v61 = vld [vmem:[%s1410_s5] ss:$0 sm:$0xff] }
  0x35   :  { %709 = vmatpush.bf16.msrb.mxu3 %v1203_v7 }
  0x36   :  { %527 = vmatpush.bf16.msrb.mxu0 %v1178_v41 }
  0x37   :  { %540 = vmatpush.bf16.msrb.mxu1 %v1186_v42 }
  0x38   :  { %622 = vmatpush.bf16.msrb.mxu2 %v1194_v62 }
  0x39   :  { %710 = vmatpush.bf16.msrb.mxu3 %v1202_v8 }
  0x3a   :  { %528 = vmatpush.bf16.msrb.mxu0 %v1177_v45 }
  0x3b   :  { %541 = vmatpush.bf16.msrb.mxu1 %v1185_v46 }
  0x3c   :  { %623 = vmatpush.bf16.msrb.mxu2 %v1193_v63 }
  0x3d   :  { %711 = vmatpush.bf16.msrb.mxu3 %v1201_v13 }
  0x3e   :  { %529 = vmatpush.bf16.msrb.mxu0 %v1176_v47  ;;  %v1205_v47 = vld [vmem:[#allocation8 + $0x88] sm:$0xff] }
  0x3f   :  { %542 = vmatpush.bf16.msrb.mxu1 %v1184_v48  ;;  %v1204_v48 = vld [vmem:[#allocation8 + $0x80] sm:$0xff] }
  0x40   :  { %624 = vmatpush.bf16.msrb.mxu2 %v1192_v0 }
  0x41   :  { %712 = vmatpush.bf16.msrb.mxu3 %v1200_v15 }
  0x42   :  { %530 = vmatpush.bf16.msrb.mxu0 %v1175_v49  ;;  %v1222_v49 = vld [vmem:[%s1409_s4 + $0x1] ss:$0 sm:$0xff]  ;;  %s1334_s4 = smov [#allocation9]  }
  0x43   :  { %543 = vmatpush.bf16.msrb.mxu1 %v1183_v50  ;;  %s837_s25 = sshll.u32 %s1334_s4, 4  ;;  %s838_s25 = int_to_ptr.vmem [resolvable:$true] %s837_s25 }
  0x44   :  { %625 = vmatpush.bf16.msrb.mxu2 %v1191_v1 }
  0x45   :  { %713 = vmatpush.bf16.msrb.mxu3 %v1199_v19 }
  0x46   :  { %531 = vmatpush.bf16.msrb.mxu0 %v1174_v51 }
  0x47   :  { %544 = vmatpush.bf16.msrb.mxu1 %v1182_v52 }
  0x48   :  { %626 = vmatpush.bf16.msrb.mxu2 %v1190_v2  ;;  %v1333_v2 = vmov 0  }
  0x49   :  { %714 = vmatpush.bf16.msrb.mxu3 %v1198_v21  ;;  %1219 = vset.pattern.permute.xlu0 %v1333_v2 }
  0x4a   :  { %532 = vmatpush.bf16.msrb.mxu0 %v1173_v53 }
  0x4b   :  { %545 = vmatpush.bf16.msrb.mxu1 %v1181_v54 }
  0x4c   :  { %627 = vmatpush.bf16.msrb.mxu2 %v1189_v3  ;;  %v1225_v3 = vld [vmem:[#allocation2] ss:$0 sm:$0xff] }
  0x4d   :  { %715 = vmatpush.bf16.msrb.mxu3 %v1197_v31 }
  0x4e   :  { %533 = vmatpush.bf16.msrb.mxu0 %v1172_v55 }
  0x4f   :  { %546 = vmatpush.bf16.msrb.mxu1 %v1180_v56 }
  0x50   :  { %628 = vmatpush.bf16.msrb.mxu2 %v1188_v4 }
  0x51   :  { %534 = vmatmul.bf16.vlgmr.msrb.gmra.mxu0 %v84_v59  ;;  %716 = vmatpush.bf16.msrb.mxu3 %v1196_v32 }
  0x52   :  { %547 = vmatmul.bf16.vlgmr.msrb.gmra.mxu1 %v85_v60  ;;  %797 = vmatpush.bf16.msra.mxu0 %v1211_v33 }
  0x56   :  { %798 = vmatpush.bf16.msra.mxu0 %v1210_v34 }
  0x5a   :  { %799 = vmatpush.bf16.msra.mxu0 %v1209_v35 }
  0x5e   :  { %800 = vmatpush.bf16.msra.mxu0 %v1208_v36 }
  0x62   :  { %801 = vmatpush.bf16.msra.mxu0 %v1207_v37 }
  0x66   :  { %802 = vmatpush.bf16.msra.mxu0 %v1206_v38 }
  0x6a   :  { %803 = vmatpush.bf16.msra.mxu0 %v1205_v47 }
  0x6e   :  { %804 = vmatpush.bf16.msra.mxu0 %v1204_v48 }
  0xae   :  { %v483_v5 = vpop.f32.mrf.mxu0 }
  0xaf   :  { %v496_v6 = vpop.f32.mrf.mxu1  ;;  %v484_v16 = vadd.f32 %v1220_v14, %v483_v5 }
  0xb1   :  { %v497_v20 = vadd.f32 %v496_v6, %v484_v16 }
  0xb6   :  { %v485_v9 = vpop.f32.mrf.mxu0  ;;  %v509_v11 = vpop.f32.mrf.mxu2 }
  0xb7   :  { %v498_v10 = vpop.f32.mrf.mxu1  ;;  %v522_v12 = vpop.f32.mrf.mxu3  ;;  %v510_v22 = vadd.f32 %v509_v11, %v497_v20 }
  0xb9   :  { %v523_v23 = vadd.f32 %v522_v12, %v510_v22 }
  0xbe   :  { %v511_v17 = vpop.f32.mrf.mxu2 }
  0xbf   :  { %v524_v18 = vpop.f32.mrf.mxu3 }
  0xce   :  { %v535_v24 = vpop.f32.mrf.mxu0 }
  0xcf   :  { %v548_v25 = vpop.f32.mrf.mxu1  ;;  %v536_v26 = vadd.f32 %v535_v24, %v523_v23 }
  0xd1   :  { %v549_v27 = vadd.f32 %v548_v25, %v536_v26 }
  0xd3   :  { %v552_v28 = vpack.c.bf16 %v549_v27, %v549_v27 }
  0xd5   :  { %629 = vmatmul.bf16.vlgmr.msrb.gmra.mxu2 %v552_v28 }
  0xd6   :  { %v537_v29 = vpop.f32.mrf.mxu0 }
  0xd7   :  { %v550_v30 = vpop.f32.mrf.mxu1 }
 0x158   :  { %v630_v40 = vpop.f32.mrf.mxu2 }
 0x159   :  { %v631_v41 = vadd.f32 %v1221_v39, %v630_v40 }
 0x15b   :  { %vm634_vm0 = vcmp.ge.f32.partialorder %v631_v41, 0.0  ;;  %v635_v42 = vmul.f32 0.2, %v631_v41 }
 0x15d   :  { %v636_v43 = vsel %vm634_vm0, %v631_v41, %v635_v42 }
 0x15e   :  { %v637_v44 = vmul.f32 1.4142135, %v636_v43 }
 0x160   :  { %v632_v45 = vpop.f32.mrf.mxu2  ;;  %v638_v46 = vpack.c.bf16 %v637_v44, %v637_v44 }
 0x162   :  { %717 = vmatmul.bf16.vlgmr.msrb.gmra.mxu3 %v638_v46 }
 0x1e5   :  { %v718_v50 = vpop.f32.mrf.mxu3 }
 0x1e6   :  { %v719_v51 = vadd.f32 %v1222_v49, %v718_v50 }
 0x1e8   :  { %vm722_vm1 = vcmp.ge.f32.partialorder %v719_v51, 0.0  ;;  %v723_v52 = vmul.f32 0.2, %v719_v51 }
 0x1ea   :  { %v724_v53 = vsel %vm722_vm1, %v719_v51, %v723_v52 }
 0x1eb   :  { %v725_v54 = vmul.f32 1.4142135, %v724_v53 }
 0x1ed   :  { %v726_v55 = vpack.c.bf16 %v725_v54, %v725_v54  ;;  %v720_v56 = vpop.f32.mrf.mxu3 }
 0x1ef   :  { %805 = vmatmul.bf16.vlgmr.msra.gmra.mxu0 %v726_v55 }
 0x26c   :  { %v806_v58 = vpop.f32.mrf.mxu0 }
 0x26d   :  { %v807_v59 = vadd.f32 %v1223_v57, %v806_v58 }
 0x26f   :  { %v811_v60 = vmul.f32 0.2, %v807_v59  ;;  %vm810_vm2 = vcmp.ge.f32.partialorder %v807_v59, 0.0 }
 0x271   :  { %v812_v62 = vsel %vm810_vm2, %v807_v59, %v811_v60 }
 0x272   :  { %v813_v63 = vmul.f32 1.4142135, %v812_v62 }
 0x274   :  { %v808_v0 = vpop.f32.mrf.mxu0  ;;  %v818_v1 = vmul.f32 %v1224_v61, %v813_v63 }
 0x276   :  { %819 = vadd.xlane.f32.xlu0 %v818_v1 }
 0x2e9   :  { %v820_v4 = vpop.xlane.xlu0 %819 }
 0x2ea   :  { %v825_v5 = vadd.f32 %v1225_v3, %v820_v4 }
 0x2ec   :  { %828 = vperm.xlu0 %1219, %v825_v5  }
 0x35e   :  { %v829_v6 = vpop.permute.xlu0 %828 }
 0x35f   :  { %831 = vst [vmem:[#allocation9] sm:$0xff] %v829_v6 }
 0x360   :  { %842 = dma.vmem_to_hbm [thread:$0]  %s838_s25, 128, %s840_s28, [#allocation5]  }
 0x361   :  { %1326 = dma.done.wait [#allocation5], 128  }
 0x362   :  { %1327 = vsyncadd [#allocation5], 4294967168 }
 0x363   :  { %847 = vsyncpa [#allocation4], 1 }
 0x364   :  { %848 = vsyncpa [#allocation7], 1 }
 0x365   :  { %849 = vsyncpa [#allocation5], 1 }

</bundles_post_ra>
